<compile_context>
chip_gen: v6e
topology: v6e:2x2x1
jax: 0.10.0
libtpu: 0.0.40
codegen_flags: <defaults>
</compile_context>

<pallas_src>
import jax
import jax.numpy as jnp
from jax.experimental import pallas as pl
from jax.experimental.pallas import tpu as pltpu

VOCAB = 10
EMB_D = 4


def _dummy_model_kernel(tok_ref, tab_ref, bias_ref, out_ref):
    # tok_ref: (TILE, 1) int32   tab_ref: (VOCAB, VOCAB) f32 (fused E @ W^T)
    # bias_ref: (1, VOCAB) f32   out_ref: (TILE, VOCAB) f32
    tile = tok_ref.shape[0]
    vocab = tab_ref.shape[0]

    ids = tok_ref[...]                                            # (TILE, 1)
    col = jax.lax.broadcasted_iota(jnp.int32, (tile, vocab), 1)   # (TILE, VOCAB)
    onehot = (col == ids).astype(jnp.float32)                     # (TILE, VOCAB)

    # Single fused matmul on the MXU: (TILE, V) @ (V, V) -> (TILE, V), + bias.
    out_ref[...] = (
        jnp.dot(onehot, tab_ref[...], preferred_element_type=jnp.float32)
        + bias_ref[...]
    )


def _round_up(x, m):
    return ((x + m - 1) // m) * m


def dummy_model_forward(x, embed_table, linear_w, linear_b):
    """x: int32 (B, S); embed_table: (vocab, d); linear_w: (vocab, d) (PyTorch
    Linear.weight layout); linear_b: (vocab,). Returns (B, S, vocab) float32."""
    B, S = x.shape
    N = B * S

    # Tile the flattened token axis; pad the tail so every tile is full.
    TILE = 512
    if N < TILE:
        TILE = max(8, _round_up(N, 8))
    N_pad = _round_up(N, TILE)
    n_tiles = N_pad // TILE

    tok = x.reshape(N).astype(jnp.int32)
    if N_pad != N:
        tok = jnp.pad(tok, (0, N_pad - N))          # pad with valid id 0
    tok = tok.reshape(N_pad, 1)

    # Fuse Embedding + Linear into one (VOCAB, VOCAB) table in the wrapper:
    # logits[n] = M[tok[n]] + b,  M = E @ W^T.
    fused_tab = (embed_table.astype(jnp.float32)
                 @ linear_w.astype(jnp.float32).T)   # (VOCAB, VOCAB)
    bias = linear_b.reshape(1, -1).astype(jnp.float32)

    cost = pl.CostEstimate(
        flops=2 * N_pad * VOCAB * VOCAB,
        transcendentals=0,
        bytes_accessed=N_pad * (4 + 4 * VOCAB) + fused_tab.size * 4 + bias.size * 4,
    )

    out = pl.pallas_call(
        _dummy_model_kernel,
        out_shape=jax.ShapeDtypeStruct((N_pad, VOCAB), jnp.float32),
        grid=(n_tiles,),
        in_specs=[
            pl.BlockSpec((TILE, 1), lambda i: (i, 0)),          # tokens: tiled
            pl.BlockSpec((VOCAB, VOCAB), lambda i: (0, 0)),     # fused table: resident
            pl.BlockSpec((1, VOCAB), lambda i: (0, 0)),         # bias: resident
        ],
        out_specs=pl.BlockSpec((TILE, VOCAB), lambda i: (i, 0)),
        compiler_params=pltpu.CompilerParams(
            dimension_semantics=("parallel",)),
        cost_estimate=cost,
    )(tok, fused_tab, bias)

    return out[:N].reshape(B, S, VOCAB)


def _init_params(key):
    k_emb, k_w, k_b = jax.random.split(key, 3)
    # Deterministic synthetic init (mimics nn.Embedding ~ N(0,1),
    # nn.Linear ~ U(-1/sqrt(in), 1/sqrt(in))).
    embed_table = jax.random.normal(k_emb, (VOCAB, EMB_D), dtype=jnp.float32)
    bound = 1.0 / jnp.sqrt(EMB_D)
    linear_w = jax.random.uniform(k_w, (VOCAB, EMB_D), minval=-bound,
                                  maxval=bound, dtype=jnp.float32)
    linear_b = jax.random.uniform(k_b, (VOCAB,), minval=-bound,
                                  maxval=bound, dtype=jnp.float32)
    return embed_table, linear_w, linear_b


if __name__ == "__main__":
    key = jax.random.PRNGKey(0)
    k_params, k_tok = jax.random.split(key)
    embed_table, linear_w, linear_b = _init_params(k_params)

    B, S = 2, 8
    x = jax.random.randint(k_tok, (B, S), 0, VOCAB, dtype=jnp.int32)

    logits = dummy_model_forward(x, embed_table, linear_w, linear_b)
    jax.block_until_ready(logits)

    # Reference check in plain JAX (same math as the PyTorch forward).
    ref = embed_table[x] @ linear_w.T + linear_b
    assert logits.shape == (B, S, VOCAB)
    assert jnp.allclose(logits, ref, atol=1e-5), "mismatch vs reference"

    # TODO(synk): `generate` is pure host-side sampling/concat (torch.randint +
    # torch.cat) with no tensor hot path — not implemented as a kernel.

    print("KERNEL_OK")
</pallas_src>

<mosaic_0001>
module attributes {stable_mosaic.version = 11 : i64} {
  func.func @_dummy_model_kernel(%arg0: i32, %arg1: memref<16x1xi32, #tpu.memory_space<vmem>>, %arg2: memref<10x10xf32, #tpu.memory_space<vmem>>, %arg3: memref<1x10xf32, #tpu.memory_space<vmem>>, %arg4: memref<16x10xf32, #tpu.memory_space<vmem>>) attributes {dimension_semantics = [#tpu.dimension_semantics<parallel>], iteration_bounds = array<i64: 1>, scalar_prefetch = 0 : i64, scratch_operands = 0 : i64, tpu.core_type = #tpu.core_type<tc>, window_params = [{transform_indices = @transform_0, window_bounds = array<i64: 16, 1>}, {pipeline_mode = #tpu.pipeline_mode<synchronous>, transform_indices = @transform_1, window_bounds = array<i64: 10, 10>}, {pipeline_mode = #tpu.pipeline_mode<synchronous>, transform_indices = @transform_2, window_bounds = array<i64: 1, 10>}, {transform_indices = @transform_3, window_bounds = array<i64: 16, 10>}]} {
    %c0 = arith.constant 0 : index
    %c0_0 = arith.constant 0 : index
    %0 = vector.load %arg1[%c0, %c0_0] : memref<16x1xi32, #tpu.memory_space<vmem>>, vector<16x1xi32>
    %1 = tpu.iota {dimensions = array<i32: 1>} : vector<16x10xi32>
    %2 = vector.broadcast %0 : vector<16x1xi32> to vector<16x10xi32>
    %3 = arith.cmpi eq, %1, %2 : vector<16x10xi32>
    %4 = arith.extui %3 : vector<16x10xi1> to vector<16x10xi32>
    %5 = arith.sitofp %4 : vector<16x10xi32> to vector<16x10xf32>
    %c0_1 = arith.constant 0 : index
    %c0_2 = arith.constant 0 : index
    %6 = vector.load %arg2[%c0_1, %c0_2] : memref<10x10xf32, #tpu.memory_space<vmem>>, vector<10x10xf32>
    %cst = arith.constant dense<0.000000e+00> : vector<16x10xf32>
    %7 = tpu.matmul %5, %6, %cst {dimension_numbers = #tpu.dot_dimension_numbers<[1], [0], [0], [1], [0, 0, 1, 1], [], []>} : vector<16x10xf32>, vector<10x10xf32>, vector<16x10xf32> -> vector<16x10xf32>
    %c0_3 = arith.constant 0 : index
    %c0_4 = arith.constant 0 : index
    %8 = vector.load %arg3[%c0_3, %c0_4] : memref<1x10xf32, #tpu.memory_space<vmem>>, vector<1x10xf32>
    %9 = vector.broadcast %8 : vector<1x10xf32> to vector<16x10xf32>
    %10 = arith.addf %7, %9 : vector<16x10xf32>
    %c0_5 = arith.constant 0 : index
    %c0_6 = arith.constant 0 : index
    %11 = vector.load %arg4[%c0_5, %c0_6] : memref<16x10xf32, #tpu.memory_space<vmem>>, vector<16x10xf32>
    tpu.vector_store %arg4[%c0_5, %c0_6], %10 {strides = array<i32>} : memref<16x10xf32, #tpu.memory_space<vmem>>, vector<16x10xf32>,
    return
  }
  func.func @transform_0(%arg0: i32) -> (i32, i32) {
    %c0_i32 = arith.constant 0 : i32
    %c0_i32_0 = arith.constant 0 : i32
    return %arg0, %c0_i32 : i32, i32
  }
  func.func @transform_1(%arg0: i32) -> (i32, i32) {
    %c0_i32 = arith.constant 0 : i32
    %c0_i32_0 = arith.constant 0 : i32
    %c0_i32_1 = arith.constant 0 : i32
    return %c0_i32, %c0_i32_0 : i32, i32
  }
  func.func @transform_2(%arg0: i32) -> (i32, i32) {
    %c0_i32 = arith.constant 0 : i32
    %c0_i32_0 = arith.constant 0 : i32
    %c0_i32_1 = arith.constant 0 : i32
    return %c0_i32, %c0_i32_0 : i32, i32
  }
  func.func @transform_3(%arg0: i32) -> (i32, i32) {
    %c0_i32 = arith.constant 0 : i32
    %c0_i32_0 = arith.constant 0 : i32
    return %arg0, %c0_i32 : i32, i32
  }
}

</mosaic_0001>

<bundles_post_ra>
// kernel: tpu_custom_call.1
= control target key start
LH: loop header
LB: loop body
LE: loop exit
PB: predicated region body
PF: predicated region fallthrough
CT: control target
= control target key end

     0   :  { %vm47_vm0 = vcmask 1041408   ;;  %v189_v2 = vmov 0   ;;  %s236_s0 = inlined_call_operand.vmem [shape: s32[16,1], index: 0, kind: input, shape index: {}]   ;;  %s237_s1 = inlined_call_operand.vmem [shape: f32[10,10], index: 1, kind: input, shape index: {}]   ;;  %s238_s2 = inlined_call_operand.vmem [shape: f32[1,10], index: 2, kind: input, shape index: {}]   ;;  %s239_s3 = inlined_call_operand.hbm [shape: f32[16,10], index: 3, kind: output, shape index: {}]  }
   0x1   :  { %v15_v0 = vld [vmem:[%s236_s0] sm:$0xff]  ;;  %v32_v1 = vld [vmem:[%s237_s1 + $0x8] sm:$0x3]  ;;  %166 = vset.pattern.permute.xlu0 %v189_v2 }
   0x2   :  { %154 = vmatprep.subr.msk.mxu0 %vm47_vm0, %v32_v1  ;;  %v31_v3 = vld [vmem:[%s237_s1] sm:$0xff] }
   0x3   :  { %8 = vsyncpa [#allocation3], 0  ;;  %20 = vperm.xlu0 %166, %v15_v0   ;;  %155 = vmatpush3.msk.msra.mxu0 %vm47_vm0, %v32_v1  ;;  %v16_v4 = vld [vmem:[%s236_s0 + $0x8] sm:$0xff]  ;;  %v17_v5 = vlaneseq  ;;  %vm40_vm1 = vcmask 80896   ;;  %v190_v8 = vmov 0.0   ;;  %s191_s0 = smov [#allocation2]  }
   0x4   :  { %156 = vmatprep.subr.mxu0 %v31_v3  ;;  %v146_v12 = vld [vmem:[%s238_s2] ss:$0 sm:$0xff]  ;;  %s133_s21 = sshll.u32 %s191_s0, 4  ;;  %s134_s21 = int_to_ptr.vmem [resolvable:$true] %s133_s21 }
   0x5   :  { %157 = vmatpush3.msra.mxu0 %v31_v3  ;;  %v18_v6 = vand.u32 127, %v17_v5  ;;  %s167_s22 = scalar_lea.vmem %s134_s21, 256  ;;  %p172_p1 = scmp.lt.s32.totalorder %s134_s21, %s134_s21 }
   0x6   :  { %p168_p0 = scmp.ne.s32.totalorder %s134_s21, %s167_s22  ;;  %p173_p2 = scmp.lt.s32.totalorder %s167_s22, %s167_s22 }
   0x7   :  { %23 = vperm.xlu0 %166, %v16_v4  }
   0x8   :  { %p174_p3 = por %p173_p2, %p172_p1 }
   0xa   :  { %p175_p4 = pnand %p174_p3, %p168_p0 }
  0x7e   :  { %v21_v7 = vpop.permute.xlu0 %20 }
  0x7f   :  { %vm25_vm2 = vcmp.eq.s32.totalorder %v18_v6, %v21_v7 }
  0x80   :  { %v144_v9 = vsel %vm25_vm2, 1.0, %v190_v8 }
  0x81   :  { %158 = vmatprep.mubr.msk.f32.mxu0 %vm40_vm1, %v144_v9 }
  0x82   :  { %v24_v10 = vpop.permute.xlu0 %23 }
  0x83   :  { %vm26_vm3 = vcmp.eq.s32.totalorder %v18_v6, %v24_v10 }
  0x84   :  { %v145_v11 = vsel %vm26_vm3, 1.0, %v190_v8 }
  0x85   :  { %159 = vmatmul.mubr.msk.f32.vlgmr.msra.gmra.mxu0 %vm40_vm1, %v145_v11 }
 0x145   :  { %v160_v13 = vpop.f32.mrf.mxu0 }
 0x146   :  { %v123_v14 = vadd.f32 %v160_v13, %v146_v12 }
 0x147   :  { %v117_v15 = vpop.f32.mrf.mxu0 }
 0x148   :  { %127 = vst.msk [vmem:[#allocation2 + $0x8] sm:$0xff] %vm40_vm1, %v123_v14  ;;  %v118_v16 = vadd.f32 %v146_v12, %v117_v15 }
 0x14a   :  { %126 = vst.msk [vmem:[#allocation2] sm:$0xff] %vm40_vm1, %v118_v16 }
 0x14b   :  { %178 = shalt.err (!%p175_p4)
}
 0x14c   :  { %s192_s23 = smov 128   ;;  %s193_s2 = smov 8  }
 0x14d   :  { %139 = dma.vmem_to_hbm [thread:$0]  %s134_s21, 256, %s239_s3, [#allocation3], %s192_s23, %s192_s23, %s193_s2  }
 0x14e   :  { %187 = dma.done.wait [#allocation3], 256  }
 0x14f   :  { %188 = vsyncadd [#allocation3], 4294967040 }
 0x150   :  { %143 = vsyncpa [#allocation3], 1 }

</bundles_post_ra>
